<compile_context>
chip_gen: v6e
topology: v6e:2x2x1
jax: 0.10.0
libtpu: 0.0.40
codegen_flags: <defaults>
</compile_context>

<pallas_src>
from functools import lru_cache

import numpy as np
import jax
import jax.numpy as jnp
from jax import lax
from jax.experimental import pallas as pl
from jax.experimental.pallas import tpu as pltpu

C_PAD = 128  # classes padded to one full lane width for the similarity/output


def _round_up(x, m):
    return (x + m - 1) // m * m


@lru_cache(maxsize=None)
def _mean_selector(num_class, n_support, dtype):
    """Static [C8, Ns] matrix averaging each class's support rows (zero rows
    for padded classes)."""
    assert n_support % num_class == 0, "support size must divide num_class"
    per = n_support // num_class
    c8 = _round_up(num_class, 8)
    s = np.zeros((c8, n_support), dtype=np.float32)
    for c in range(num_class):
        s[c, c * per:(c + 1) * per] = 1.0 / per
    return jnp.asarray(s, dtype=dtype)


@lru_cache(maxsize=None)
def _class_mask(num_class):
    """Additive lane mask [1, C_PAD]: 0 for valid class lanes, -1e30 for pad."""
    m = np.full((1, C_PAD), -1e30, dtype=np.float32)
    m[0, :num_class] = 0.0
    return jnp.asarray(m)


def few_model_kernel(sup_ref, qry_ref, sel_ref, w_ref, b_ref, mask_ref,
                     out_ref, proto_pad_ref):
    sup = sup_ref[0]        # [Ns,  D]  (mxu dtype)
    qry = qry_ref[0]        # [Nq8, D]  (mxu dtype)
    sel = sel_ref[...]      # [C8,  Ns] (mxu dtype)  class-mean selector
    w = w_ref[...]          # [D,   H]  (mxu dtype)
    b = b_ref[...]          # [1,   H]  float32
    mask = mask_ref[...]    # [1, 128]  float32 additive lane mask

    c8 = sel.shape[0]

    # ---- class-mean first (mean commutes with the affine map): only C8 rows
    #      go through the DxH embedding matmul.
    mean_feats = jnp.dot(sel, sup, preferred_element_type=jnp.float32)       # [C8, D]
    proto = jnp.dot(mean_feats.astype(w.dtype), w,
                    preferred_element_type=jnp.float32) + b                  # [C8, H]
    qemb = jnp.dot(qry, w, preferred_element_type=jnp.float32) + b           # [Nq8, H]

    # ---- cosine similarity: rsqrt on the EUP, prototype norm folded into rows
    eps_sq = jnp.float32(1e-16)
    p_sq = jnp.sum(proto * proto, axis=1, keepdims=True)                     # [C8, 1]
    q_sq = jnp.sum(qemb * qemb, axis=1, keepdims=True)                       # [Nq8, 1]
    proto_n = proto * lax.rsqrt(jnp.maximum(p_sq, eps_sq))                   # [C8, H]
    inv_q = lax.rsqrt(jnp.maximum(q_sq, eps_sq))                             # [Nq8, 1]

    # Zero-pad prototypes to 128 rows ONLY for the similarity dot (lane-dense
    # output).  Zeroed every grid step (a ~16 KiB VMEM store) so it stays
    # correct when the batch axis is sharded across TensorCores (each core has
    # its own scratch and may never see program_id == 0).
    proto_pad_ref[...] = jnp.zeros(proto_pad_ref.shape, jnp.float32)
    proto_pad_ref[0:c8, :] = proto_n

    # TODO(synk): confirm via pl.lower_as_mlir that this RHS-dim-1 contraction
    # feeds the MXU without an XLU vxpose; if it does, keep proto in [H, 128].
    dots = lax.dot_general(
        qemb, proto_pad_ref[...],
        dimension_numbers=(((1,), (1,)), ((), ())),
        preferred_element_type=jnp.float32)                                  # [Nq8, 128]

    cos = dots * inv_q + mask         # padded class lanes -> -1e30
    m = jnp.max(cos, axis=1, keepdims=True)
    shifted = cos - m
    lse = jnp.log(jnp.sum(jnp.exp(shifted), axis=1, keepdims=True))
    out_ref[0] = shifted - lse        # lane-dense [Nq8, 128] store


def few_model_forward_batched(support, query, weight, bias, num_class,
                              *, mxu_dtype=jnp.float32):
    """support: [B, Ns, D], query: [B, Nq, D], weight: [D, H], bias: [H]."""
    B, ns, d = support.shape
    _, nq, _ = query.shape
    h = weight.shape[1]
    assert ns % num_class == 0, "support size must be divisible by num_class"
    assert num_class <= C_PAD, "kernel supports at most 128 classes"
    c8 = _round_up(num_class, 8)
    nq8 = _round_up(nq, 8)

    sel = _mean_selector(num_class, ns, mxu_dtype)       # static, cached
    mask = _class_mask(num_class)                        # static, cached

    sup_in = support.astype(mxu_dtype)
    qry_in = query.astype(mxu_dtype)
    if nq8 != nq:
        qry_in = jnp.pad(qry_in, ((0, 0), (0, nq8 - nq), (0, 0)))
    w_in = weight.astype(mxu_dtype)
    b_in = bias.reshape(1, h).astype(jnp.float32)

    grid_spec = pltpu.PrefetchScalarGridSpec(
        num_scalar_prefetch=0,
        grid=(B,),
        in_specs=[
            pl.BlockSpec((1, ns, d), lambda b: (b, 0, 0)),    # support (per episode)
            pl.BlockSpec((1, nq8, d), lambda b: (b, 0, 0)),   # query   (per episode)
            pl.BlockSpec((c8, ns), lambda b: (0, 0)),         # selector (resident)
            pl.BlockSpec((d, h), lambda b: (0, 0)),           # W        (resident)
            pl.BlockSpec((1, h), lambda b: (0, 0)),           # bias     (resident)
            pl.BlockSpec((1, C_PAD), lambda b: (0, 0)),       # class mask (resident)
        ],
        out_specs=pl.BlockSpec((1, nq8, C_PAD), lambda b: (b, 0, 0)),
        scratch_shapes=[pltpu.VMEM((C_PAD, h), jnp.float32)],
    )

    out_pad = pl.pallas_call(
        few_model_kernel,
        out_shape=jax.ShapeDtypeStruct((B, nq8, C_PAD), jnp.float32),
        grid_spec=grid_spec,
        compiler_params=pltpu.CompilerParams(
            dimension_semantics=("parallel",)),
    )(sup_in, qry_in, sel, w_in, b_in, mask)

    return out_pad[:, :nq, :num_class]


def few_model_forward(support, query, weight, bias, num_class,
                      *, mxu_dtype=jnp.float32):
    """Single-episode interface matching fewModel.forward."""
    out = few_model_forward_batched(support[None], query[None], weight, bias,
                                    num_class, mxu_dtype=mxu_dtype)
    return out[0]


def _reference_single(sup, qry, weight, bias, num_class):
    sup_emb = sup @ weight + bias
    qry_emb = qry @ weight + bias
    per = sup.shape[0] // num_class
    proto = sup_emb.reshape(num_class, per, -1).mean(axis=1)
    dots = qry_emb @ proto.T
    qn = jnp.linalg.norm(qry_emb, axis=1, keepdims=True)
    pn = jnp.linalg.norm(proto, axis=1, keepdims=True)
    cos = dots / jnp.maximum(qn * pn.T, 1e-8)
    return jax.nn.log_softmax(cos, axis=1)


if __name__ == "__main__":
    # Small shapes consistent with the module's forward.
    input_dim = 16
    hidden_dim = 32
    num_class = 4
    per_class = 2
    n_support = num_class * per_class      # 8
    n_query = 4
    batch = 6                              # few-shot episodes batched on the grid

    key = jax.random.PRNGKey(0)
    k1, k2, k3, k4 = jax.random.split(key, 4)

    # Deterministic parameter init (mimics nn.Linear's uniform init).
    bound = 1.0 / (input_dim ** 0.5)
    weight = jax.random.uniform(k1, (input_dim, hidden_dim),
                                minval=-bound, maxval=bound, dtype=jnp.float32)
    bias = jax.random.uniform(k2, (hidden_dim,),
                              minval=-bound, maxval=bound, dtype=jnp.float32)

    support = jax.random.normal(k3, (batch, n_support, input_dim), dtype=jnp.float32)
    query = jax.random.normal(k4, (batch, n_query, input_dim), dtype=jnp.float32)

    # Batched run (f32 MXU operands).
    out = few_model_forward_batched(support, query, weight, bias, num_class)
    out = jax.block_until_ready(out)
    assert out.shape == (batch, n_query, num_class)

    ref = jnp.stack([_reference_single(support[i], query[i], weight, bias, num_class)
                     for i in range(batch)])
    assert jnp.allclose(out, ref, atol=1e-4, rtol=1e-4)

    # Single-episode module interface (grid of 1).
    out1 = few_model_forward(support[0], query[0], weight, bias, num_class)
    out1 = jax.block_until_ready(out1)
    assert out1.shape == (n_query, num_class)
    assert jnp.allclose(out1, ref[0], atol=1e-4, rtol=1e-4)

    # bf16 MXU operands (fast path for v6e/v7x); f32 accumulation & softmax.
    out_bf16 = few_model_forward_batched(support, query, weight, bias, num_class,
                                         mxu_dtype=jnp.bfloat16)
    out_bf16 = jax.block_until_ready(out_bf16)
    assert jnp.all(jnp.isfinite(out_bf16))
    assert jnp.allclose(out_bf16, ref, atol=0.1, rtol=0)

    print("KERNEL_OK")
</pallas_src>

<mosaic_0001>
module attributes {stable_mosaic.version = 11 : i64} {
  func.func @few_model_kernel(%arg0: i32, %arg1: memref<1x8x16xf32, #tpu.memory_space<vmem>>, %arg2: memref<1x8x16xf32, #tpu.memory_space<vmem>>, %arg3: memref<8x8xf32, #tpu.memory_space<vmem>>, %arg4: memref<16x32xf32, #tpu.memory_space<vmem>>, %arg5: memref<1x32xf32, #tpu.memory_space<vmem>>, %arg6: memref<1x128xf32, #tpu.memory_space<vmem>>, %arg7: memref<1x8x128xf32, #tpu.memory_space<vmem>>, %arg8: memref<128x32xf32, #tpu.memory_space<vmem>>) attributes {dimension_semantics = [#tpu.dimension_semantics<parallel>], iteration_bounds = array<i64: 6>, scalar_prefetch = 0 : i64, scratch_operands = 1 : i64, tpu.core_type = #tpu.core_type<tc>, window_params = [{transform_indices = @transform_0, window_bounds = array<i64: 1, 8, 16>}, {transform_indices = @transform_1, window_bounds = array<i64: 1, 8, 16>}, {pipeline_mode = #tpu.pipeline_mode<synchronous>, transform_indices = @transform_2, window_bounds = array<i64: 8, 8>}, {pipeline_mode = #tpu.pipeline_mode<synchronous>, transform_indices = @transform_3, window_bounds = array<i64: 16, 32>}, {pipeline_mode = #tpu.pipeline_mode<synchronous>, transform_indices = @transform_4, window_bounds = array<i64: 1, 32>}, {pipeline_mode = #tpu.pipeline_mode<synchronous>, transform_indices = @transform_5, window_bounds = array<i64: 1, 128>}, {transform_indices = @transform_6, window_bounds = array<i64: 1, 8, 128>}]} {
    %c0 = arith.constant 0 : index
    %c0_0 = arith.constant 0 : index
    %c0_1 = arith.constant 0 : index
    %0 = vector.load %arg1[%c0, %c0_0, %c0_1] : memref<1x8x16xf32, #tpu.memory_space<vmem>>, vector<1x8x16xf32>
    %1 = vector.shape_cast %0 : vector<1x8x16xf32> to vector<8x16xf32>
    %c0_2 = arith.constant 0 : index
    %c0_3 = arith.constant 0 : index
    %c0_4 = arith.constant 0 : index
    %2 = vector.load %arg2[%c0_2, %c0_3, %c0_4] : memref<1x8x16xf32, #tpu.memory_space<vmem>>, vector<1x8x16xf32>
    %3 = vector.shape_cast %2 : vector<1x8x16xf32> to vector<8x16xf32>
    %c0_5 = arith.constant 0 : index
    %c0_6 = arith.constant 0 : index
    %4 = vector.load %arg3[%c0_5, %c0_6] : memref<8x8xf32, #tpu.memory_space<vmem>>, vector<8x8xf32>
    %c0_7 = arith.constant 0 : index
    %c0_8 = arith.constant 0 : index
    %5 = vector.load %arg4[%c0_7, %c0_8] : memref<16x32xf32, #tpu.memory_space<vmem>>, vector<16x32xf32>
    %c0_9 = arith.constant 0 : index
    %c0_10 = arith.constant 0 : index
    %6 = vector.load %arg5[%c0_9, %c0_10] : memref<1x32xf32, #tpu.memory_space<vmem>>, vector<1x32xf32>
    %c0_11 = arith.constant 0 : index
    %c0_12 = arith.constant 0 : index
    %7 = vector.load %arg6[%c0_11, %c0_12] : memref<1x128xf32, #tpu.memory_space<vmem>>, vector<1x128xf32>
    %cst = arith.constant dense<0.000000e+00> : vector<8x16xf32>
    %8 = tpu.matmul %4, %1, %cst {dimension_numbers = #tpu.dot_dimension_numbers<[1], [0], [0], [1], [0, 0, 1, 1], [], []>} : vector<8x8xf32>, vector<8x16xf32>, vector<8x16xf32> -> vector<8x16xf32>
    %cst_13 = arith.constant dense<0.000000e+00> : vector<8x32xf32>
    %9 = tpu.matmul %8, %5, %cst_13 {dimension_numbers = #tpu.dot_dimension_numbers<[1], [0], [0], [1], [0, 0, 1, 1], [], []>} : vector<8x16xf32>, vector<16x32xf32>, vector<8x32xf32> -> vector<8x32xf32>
    %10 = vector.broadcast %6 : vector<1x32xf32> to vector<8x32xf32>
    %11 = arith.addf %9, %10 : vector<8x32xf32>
    %cst_14 = arith.constant dense<0.000000e+00> : vector<8x32xf32>
    %12 = tpu.matmul %3, %5, %cst_14 {dimension_numbers = #tpu.dot_dimension_numbers<[1], [0], [0], [1], [0, 0, 1, 1], [], []>} : vector<8x16xf32>, vector<16x32xf32>, vector<8x32xf32> -> vector<8x32xf32>
    %13 = vector.broadcast %6 : vector<1x32xf32> to vector<8x32xf32>
    %14 = arith.addf %12, %13 : vector<8x32xf32>
    %15 = arith.mulf %11, %11 : vector<8x32xf32>
    %cst_15 = arith.constant dense<0.000000e+00> : vector<8xf32>
    %16 = vector.multi_reduction <add>, %15, %cst_15 [1] : vector<8x32xf32> to vector<8xf32>
    %17 = vector.shape_cast %16 : vector<8xf32> to vector<8x1xf32>
    %18 = arith.mulf %14, %14 : vector<8x32xf32>
    %cst_16 = arith.constant dense<0.000000e+00> : vector<8xf32>
    %19 = vector.multi_reduction <add>, %18, %cst_16 [1] : vector<8x32xf32> to vector<8xf32>
    %20 = vector.shape_cast %19 : vector<8xf32> to vector<8x1xf32>
    %cst_17 = arith.constant 1.000000e-16 : f32
    %21 = vector.broadcast %cst_17 : f32 to vector<8x1xf32>
    %22 = arith.maximumf %17, %21 : vector<8x1xf32>
    %23 = math.rsqrt %22 : vector<8x1xf32>
    %24 = vector.broadcast %23 : vector<8x1xf32> to vector<8x32xf32>
    %25 = arith.mulf %11, %24 : vector<8x32xf32>
    %cst_18 = arith.constant 1.000000e-16 : f32
    %26 = vector.broadcast %cst_18 : f32 to vector<8x1xf32>
    %27 = arith.maximumf %20, %26 : vector<8x1xf32>
    %28 = math.rsqrt %27 : vector<8x1xf32>
    %cst_19 = arith.constant 0.000000e+00 : f32
    %29 = vector.broadcast %cst_19 : f32 to vector<128x32xf32>
    %c0_20 = arith.constant 0 : index
    %c0_21 = arith.constant 0 : index
    %30 = vector.load %arg8[%c0_20, %c0_21] : memref<128x32xf32, #tpu.memory_space<vmem>>, vector<128x32xf32>
    tpu.vector_store %arg8[%c0_20, %c0_21], %29 {strides = array<i32>} : memref<128x32xf32, #tpu.memory_space<vmem>>, vector<128x32xf32>,
    %c0_22 = arith.constant 0 : index
    %c0_23 = arith.constant 0 : index
    %31 = vector.load %arg8[%c0_22, %c0_23] : memref<128x32xf32, #tpu.memory_space<vmem>>, vector<8x32xf32>
    tpu.vector_store %arg8[%c0_22, %c0_23], %25 {strides = array<i32>} : memref<128x32xf32, #tpu.memory_space<vmem>>, vector<8x32xf32>,
    %c0_24 = arith.constant 0 : index
    %c0_25 = arith.constant 0 : index
    %32 = vector.load %arg8[%c0_24, %c0_25] : memref<128x32xf32, #tpu.memory_space<vmem>>, vector<128x32xf32>
    %cst_26 = arith.constant dense<0.000000e+00> : vector<8x128xf32>
    %33 = tpu.matmul %14, %32, %cst_26 {dimension_numbers = #tpu.dot_dimension_numbers<[1], [1], [0], [0], [0, 0, 1, 0], [], []>} : vector<8x32xf32>, vector<128x32xf32>, vector<8x128xf32> -> vector<8x128xf32>
    %34 = vector.broadcast %28 : vector<8x1xf32> to vector<8x128xf32>
    %35 = arith.mulf %33, %34 : vector<8x128xf32>
    %36 = vector.broadcast %7 : vector<1x128xf32> to vector<8x128xf32>
    %37 = arith.addf %35, %36 : vector<8x128xf32>
    %cst_27 = arith.constant dense<0xFF800000> : vector<8xf32>
    %38 = vector.multi_reduction <maximumf>, %37, %cst_27 [1] : vector<8x128xf32> to vector<8xf32>
    %39 = vector.shape_cast %38 : vector<8xf32> to vector<8x1xf32>
    %40 = vector.broadcast %39 : vector<8x1xf32> to vector<8x128xf32>
    %41 = arith.subf %37, %40 : vector<8x128xf32>
    %42 = math.exp %41 : vector<8x128xf32>
    %cst_28 = arith.constant dense<0.000000e+00> : vector<8xf32>
    %43 = vector.multi_reduction <add>, %42, %cst_28 [1] : vector<8x128xf32> to vector<8xf32>
    %44 = vector.shape_cast %43 : vector<8xf32> to vector<8x1xf32>
    %45 = math.log %44 : vector<8x1xf32>
    %46 = vector.broadcast %45 : vector<8x1xf32> to vector<8x128xf32>
    %47 = arith.subf %41, %46 : vector<8x128xf32>
    %c0_29 = arith.constant 0 : index
    %c0_30 = arith.constant 0 : index
    %c0_31 = arith.constant 0 : index
    %48 = vector.load %arg7[%c0_29, %c0_30, %c0_31] : memref<1x8x128xf32, #tpu.memory_space<vmem>>, vector<1x8x128xf32>
    %49 = vector.shape_cast %48 : vector<1x8x128xf32> to vector<8x128xf32>
    %50 = vector.shape_cast %47 : vector<8x128xf32> to vector<1x8x128xf32>
    tpu.vector_store %arg7[%c0_29, %c0_30, %c0_31], %50 {strides = array<i32>} : memref<1x8x128xf32, #tpu.memory_space<vmem>>, vector<1x8x128xf32>,
    return
  }
  func.func @transform_0(%arg0: i32) -> (i32, i32, i32) {
    %c0_i32 = arith.constant 0 : i32
    %c0_i32_0 = arith.constant 0 : i32
    %c0_i32_1 = arith.constant 0 : i32
    return %arg0, %c0_i32, %c0_i32_0 : i32, i32, i32
  }
  func.func @transform_1(%arg0: i32) -> (i32, i32, i32) {
    %c0_i32 = arith.constant 0 : i32
    %c0_i32_0 = arith.constant 0 : i32
    %c0_i32_1 = arith.constant 0 : i32
    return %arg0, %c0_i32, %c0_i32_0 : i32, i32, i32
  }
  func.func @transform_2(%arg0: i32) -> (i32, i32) {
    %c0_i32 = arith.constant 0 : i32
    %c0_i32_0 = arith.constant 0 : i32
    %c0_i32_1 = arith.constant 0 : i32
    return %c0_i32, %c0_i32_0 : i32, i32
  }
  func.func @transform_3(%arg0: i32) -> (i32, i32) {
    %c0_i32 = arith.constant 0 : i32
    %c0_i32_0 = arith.constant 0 : i32
    %c0_i32_1 = arith.constant 0 : i32
    return %c0_i32, %c0_i32_0 : i32, i32
  }
  func.func @transform_4(%arg0: i32) -> (i32, i32) {
    %c0_i32 = arith.constant 0 : i32
    %c0_i32_0 = arith.constant 0 : i32
    %c0_i32_1 = arith.constant 0 : i32
    return %c0_i32, %c0_i32_0 : i32, i32
  }
  func.func @transform_5(%arg0: i32) -> (i32, i32) {
    %c0_i32 = arith.constant 0 : i32
    %c0_i32_0 = arith.constant 0 : i32
    %c0_i32_1 = arith.constant 0 : i32
    return %c0_i32, %c0_i32_0 : i32, i32
  }
  func.func @transform_6(%arg0: i32) -> (i32, i32, i32) {
    %c0_i32 = arith.constant 0 : i32
    %c0_i32_0 = arith.constant 0 : i32
    %c0_i32_1 = arith.constant 0 : i32
    return %arg0, %c0_i32, %c0_i32_0 : i32, i32, i32
  }
}

</mosaic_0001>

<bundles_post_ra>
// kernel: tpu_custom_call.1
= control target key start
LH: loop header
LB: loop body
LE: loop exit
PB: predicated region body
PF: predicated region fallthrough
CT: control target
= control target key end

     0   :  { %s1620_s0 = inlined_call_operand.hbm [shape: f32[6,8,16], index: 0, kind: input, shape index: {}]   ;;  %s1621_s1 = inlined_call_operand.hbm [shape: f32[6,8,16], index: 1, kind: input, shape index: {}]   ;;  %s1622_s2 = inlined_call_operand.hbm [shape: f32[8,8], index: 2, kind: input, shape index: {}]   ;;  %s1623_s3 = inlined_call_operand.hbm [shape: f32[16,32], index: 3, kind: input, shape index: {}]   ;;  %s1624_s4 = inlined_call_operand.vmem [shape: f32[1,32], index: 4, kind: input, shape index: {}]   ;;  %s1625_s5 = inlined_call_operand.vmem [shape: f32[1,128], index: 5, kind: input, shape index: {}]   ;;  %s1626_s6 = inlined_call_operand.hbm [shape: f32[6,8,128], index: 6, kind: output, shape index: {}]  }
   0x1   :  { %1631 = sst [smem:[#allocation18_spill]] %s1622_s2 }
   0x2   :  { %1632 = sst [smem:[#allocation19_spill]] %s1623_s3 }
   0x3   :  { %11 = vsyncpa [#allocation4], 0 }
   0x4   :  { %13 = vsyncpa [#allocation4 + $0x1], 0 }
   0x5   :  { %14 = vsyncpa [#allocation7], 0 }
   0x6   :  { %16 = vsyncpa [#allocation7 + $0x1], 0 }
   0x7   :  { %17 = vsyncpa [#allocation10], 0 }
   0x8   :  { %18 = vsyncpa [#allocation5], 0 }
   0x9   :  { %20 = vsyncpa [#allocation5 + $0x1], 0  ;;  %s1312_s21 = smov 0   ;;  %s1314_s22 = smov 0  }
   0xa   :  { %s1316_s23 = smov 0   ;;  %s1318_s24 = smov 0  }
   0xb LB: > { %s1333_s25 = sadd.s32 4294967295, %s1266_s24   ;;  %s878_s26 = sadd.s32 4294967294, %s1266_s24   ;;  %s1266_s24 = sphi %s1318_s24, %s1655_s24   ;;  %s1262_s23 = sphi %s1316_s23, %s1654_s23   ;;  %s1258_s22 = sphi %s1314_s22, %s1653_s22   ;;  %s1254_s21 = sphi %s1312_s21, %s1652_s21  }
   0xc   : > { %p46_p0 = scmp.ne.s32.totalorder %s1258_s22, %s1254_s21  ;;  %p1627_p1 = scmp.eq.s32.totalorder %s1333_s25, 0 }
   0xd   : > { %p186_p3 = scmp.eq.s32.totalorder %s878_s26, 5  ;;  %p879_p5 = scmp.ge.s32.totalorder %s1266_s24, 1 }
   0xe   : > { %p1342_p4 = por %p1627_p1, %p46_p0  ;;  %p193_p7 = scmp.lt.s32.totalorder %s1266_s24, 7 }
   0xf   : > { %p1347_p6 = por %p186_p3, %p46_p0  ;;  %s1268_s30 = smov [#allocation8]  }
  0x10   : > { %s1633_s27 = scalar_select %p1342_p4, 1, 0 }
  0x11   : > { %s1634_s28 = scalar_select %p1347_p6, 1, 0 }
  0x12   : > { %p1352_p8 = pnand %p879_p5, %p193_p7  ;;  %s206_s7 = sshll.u32 %s1268_s30, 4  ;;  %s207_s7 = int_to_ptr.vmem [resolvable:$true] %s206_s7 }
  0x13   : > { %s1269_s8 = smov [#allocation9]   ;;  %s1093_s11 = scalar_lea.vmem %s207_s7, 128 }
  0x14   : > { %s1635_s29 = scalar_select %p1352_p8, 1, 0 }
  0x15   : > { %p1012_p9 = pneg %p1352_p8  ;;  %s216_s9 = sshll.u32 %s1269_s8, 4  ;;  %s217_s9 = int_to_ptr.vmem [resolvable:$true] %s216_s9 }
  0x16   : > { %p1094_p12 = scmp.ne.s32.totalorder %s207_s7, %s1093_s11  ;;  %p1101_p3 = scmp.lt.s32.totalorder %s207_s7, %s207_s7 }
  0x17   : > { %p1360_p10 = pnand %p1012_p9, %p1627_p1  ;;  %p1102_p5 = scmp.lt.s32.totalorder %s1093_s11, %s1093_s11 }
  0x19   : > { %p1084_p11 = pneg %p1360_p10  ;;  %p1103_p7 = por %p1102_p5, %p1101_p3 }
  0x1b   : > { %p1096_p13 = pnand %p1094_p12, %p1084_p11 }
  0x1d   : > { %p1097_p0 = pneg %p1096_p13 }
  0x1f   : > { %p1104_p2 = pnand %p1103_p7, %p1097_p0 }
  0x21   : > { %1107 = shalt.err (!%p1104_p2)
}
  0x22   : > { %s1637_s2 = sld [smem:[#allocation18_spill]]  ;;  %s1119_s14 = scalar_lea.vmem %s217_s9, 256 }
  0x23   : > { %p1120_p9 = scmp.ne.s32.totalorder %s217_s9, %s1119_s14  ;;  %p1127_p12 = scmp.lt.s32.totalorder %s217_s9, %s217_s9 }
  0x24   : > { %p1128_p13 = scmp.lt.s32.totalorder %s1119_s14, %s1119_s14 }
  0x25   : > { %p1122_p1 = pnand %p1120_p9, %p1084_p11 }
  0x26   : > { %p1129_p4 = por %p1128_p13, %p1127_p12 }
  0x27   : > { %p1123_p6 = pneg %p1122_p1 }
  0x28   : > { %1015 = dma.hbm_to_vmem [thread:$0]  (!%p1360_p10), %s1637_s2, 128, %s207_s7, [#allocation7]  }
  0x29   : > { %p1130_p8 = pnand %p1129_p4, %p1123_p6 }
  0x2b   : > { %1133 = shalt.err (!%p1130_p8)
}
  0x2c   : > { %s1270_s15 = smov 128   ;;  %s1271_s16 = smov 8  }
  0x2d   : > { %s1638_s3 = sld [smem:[#allocation19_spill]]  ;;  %s1383_s19 = sadd.s32 1, %s1266_s24  }
  0x2e   : > { %s33_s20 = sadd.s32 1, %s1262_s23  ;;  %s30_s26 = ssub.s32 %s1266_s24, %s1383_s19 }
  0x2f   : > { %p40_p1 = scmp.ne.s32.totalorder %s1262_s23, %s1258_s22  ;;  %p31_p2 = scmp.eq.s32.totalorder %s30_s26, 0 }
  0x30   : > { %p41_p4 = scmp.eq.s32.totalorder %s1266_s24, 0  ;;  %p1639_p6 = scmp.eq.s32.totalorder %s1333_s25, 5 }
  0x31   : > { %p1032_p11 = scmp.lt.s32.totalorder %s1266_s24, 6  ;;  %s236_s8 = sand.u32 1, %s1262_s23  }
  0x32   : > { %p1393_p8 = por %p1639_p6, %p40_p1  ;;  %p42_p0 = por %p41_p4, %p40_p1 }
  0x33   : > { %1018 = dma.hbm_to_vmem [thread:$0]  (!%p1360_p10), %s1638_s3, 256, %s217_s9, [#allocation10], %s1270_s15, %s1270_s15, %s1271_s16  }
  0x34   : > { %s1640_s30 = scalar_select %p1393_p8, 1, 0 }
  0x35   : > { %s1399_s7 = scalar_select %p31_p2, %s1262_s23, %s33_s20  }
  0x36   : > { %s1402_s9 = sshll.u32 %s236_s8, 3  ;;  %s884_s10 = sshll.u32 %s1266_s24, 7 }
  0x37   : > { %1641 = sst [smem:[#allocation17_spill]] %s1399_s7  ;;  %s1408_s13 = scalar_lea.hbm %s1620_s0, %s884_s10 }
  0x38   : > { %s240_s14 = scalar_lea.vmem [#allocation3], %s1402_s9  ;;  %p1413_p10 = pnand %p1032_p11, %p42_p0 }
  0x39   : > { %s247_s15 = sshll.u32 %s240_s14, 4  ;;  %s1420_s20 = scalar_lea.hbm %s1621_s1, %s884_s10  ;;  %s1411_s15 = int_to_ptr.vmem [resolvable:$true] %s247_s15 }
  0x3a   : > { %s254_s26 = sand.u32 1, %s1266_s24   ;;  %s237_s11 = scalar_lea.sflag [#allocation4], %s236_s8 }
  0x3b   : > { %s1134_s12 = scalar_lea.hbm %s1408_s13, 128  ;;  %p1136_p5 = pneg %p1413_p10 }
  0x3c   : > { %p1135_p3 = scmp.ne.s32.totalorder %s1408_s13, %s1134_s12  ;;  %s1139_s3 = scalar_lea.hbm %s1620_s0, 768 }
  0x3d   : > { %p1140_p12 = scmp.lt.s32.totalorder %s1408_s13, %s1620_s0  ;;  %p1141_p13 = scmp.lt.s32.totalorder %s1139_s3, %s1134_s12 }
  0x3e   : > { %p1137_p7 = pnand %p1136_p5, %p1135_p3 }
  0x3f   : > { %p1142_p1 = por %p1141_p13, %p1140_p12 }
  0x40   : > { %p1138_p9 = pneg %p1137_p7 }
  0x42   : > { %p1143_p2 = pnand %p1142_p1, %p1138_p9 }
  0x44   : > { %1146 = shalt.err (!%p1143_p2)
}
  0x45   : > { %s1147_s8 = scalar_lea.vmem %s1411_s15, 128  ;;  %s1272_s2 = smov [#allocation3]  }
  0x46   : > { %p1148_p4 = scmp.ne.s32.totalorder %s1411_s15, %s1147_s8  ;;  %s1152_s10 = sshll.u32 %s1272_s2, 4  ;;  %s1153_s10 = int_to_ptr.vmem [resolvable:$false] %s1152_s10 }
  0x47   : > { %s1154_s18 = scalar_lea.vmem %s1153_s10, 256  ;;  %p1155_p0 = scmp.lt.s32.totalorder %s1411_s15, %s1153_s10 }
  0x48   : > { %p1150_p6 = pnand %p1148_p4, %p1136_p5  ;;  %p1156_p3 = scmp.lt.s32.totalorder %s1154_s18, %s1147_s8 }
  0x4a   : > { %p1151_p11 = pneg %p1150_p6  ;;  %p1157_p7 = por %p1156_p3, %p1155_p0 }
  0x4c   : > { %p1158_p12 = pnand %p1157_p7, %p1151_p11 }
  0x4e   : > { %1161 = shalt.err (!%p1158_p12)
}
  0x4f   : > { %1022 = dma.hbm_to_vmem [thread:$0]  (!%p1413_p10), %s1408_s13, 128, %s1411_s15, %s237_s11  }
  0x50   : > { %s258_s3 = scalar_lea.vmem [#allocation6], %s1402_s9  ;;  %s255_s12 = scalar_lea.sflag [#allocation7], %s254_s26 }
  0x51   : > { %s265_s7 = sshll.u32 %s258_s3, 4  ;;  %s1162_s14 = scalar_lea.hbm %s1420_s20, 128  ;;  %s266_s7 = int_to_ptr.vmem [resolvable:$true] %s265_s7 }
  0x52   : > { %p1163_p9 = scmp.ne.s32.totalorder %s1420_s20, %s1162_s14  ;;  %s1167_s2 = scalar_lea.hbm %s1621_s1, 768 }
  0x53   : > { %p1168_p2 = scmp.lt.s32.totalorder %s1420_s20, %s1621_s1  ;;  %p1169_p4 = scmp.lt.s32.totalorder %s1167_s2, %s1162_s14 }
  0x54   : > { %p1165_p13 = pnand %p1163_p9, %p1136_p5 }
  0x55   : > { %p1170_p6 = por %p1169_p4, %p1168_p2 }
  0x56   : > { %p1166_p1 = pneg %p1165_p13 }
  0x58   : > { %p1171_p11 = pnand %p1170_p6, %p1166_p1 }
  0x5a   : > { %1174 = shalt.err (!%p1171_p11)
}
  0x5b   : > { %s1175_s9 = scalar_lea.vmem %s266_s7, 128  ;;  %s1273_s13 = smov [#allocation6]  }
  0x5c   : > { %p1176_p0 = scmp.ne.s32.totalorder %s266_s7, %s1175_s9  ;;  %s1180_s15 = sshll.u32 %s1273_s13, 4  ;;  %s1181_s15 = int_to_ptr.vmem [resolvable:$false] %s1180_s15 }
  0x5d   : > { %s1182_s26 = scalar_lea.vmem %s1181_s15, 256  ;;  %p1183_p12 = scmp.lt.s32.totalorder %s266_s7, %s1181_s15 }
  0x5e   : > { %p1178_p3 = pnand %p1176_p0, %p1136_p5  ;;  %p1184_p9 = scmp.lt.s32.totalorder %s1182_s26, %s1175_s9 }
  0x60   : > { %p1179_p7 = pneg %p1178_p3  ;;  %p1185_p13 = por %p1184_p9, %p1183_p12 }
  0x62   : > { %p1186_p8 = pnand %p1185_p13, %p1179_p7 }
  0x64   : > { %1189 = shalt.err (!%p1186_p8)
}
  0x65   : > { %1025 = dma.hbm_to_vmem [thread:$0]  (!%p1413_p10), %s1420_s20, 128, %s266_s7, %s255_s12  }
  0x66   : > { %p1643_p1 = scmp.ne.s32.totalorder %s1635_s29, 0 }
  0x67   : > { %s1471_s11 = sand.u32 (!%p1643_p1), 1, %s1258_s22   ;;  %p1644_p5 = scmp.ne.s32.totalorder (!%p1643_p1), %s1633_s27, 0 }
  0x68   : > { %274 = sbr.rel (%p1643_p1) target bundleno = 1203 (0x4b3), region = 44  ;;  %s1474_s3 = sshll.u32 (!%p1643_p1), %s1471_s11, 3 }
  0x69   : > { %s277_s14 = scalar_lea.sflag (!%p1643_p1), [#allocation4], %s1471_s11  ;;  %s280_s17 = scalar_lea.vmem (!%p1643_p1), [#allocation3], %s1474_s3 }
  0x6d   : > { %1233 = dma.done.wait (%p1644_p5), %s277_s14, 128  }
  0x6e   : > { %1235 = vsyncadd (%p1644_p5), %s277_s14, 4294967168  ;;  %s285_s29 = sand.u32 1, %s1333_s25   ;;  %s289_s20 = scalar_lea.vmem [#allocation6], %s1474_s3 }
  0x6f   : > { %s286_s16 = scalar_lea.sflag [#allocation7], %s285_s29 }
  0x70   : > { %1237 = dma.done.wait (%p1644_p5), %s286_s16, 128  }
  0x71   : > { %1239 = vsyncadd (%p1644_p5), %s286_s16, 4294967168  ;;  %p1645_p8 = scmp.eq.s32.totalorder %s1333_s25, 0 }
  0x73   : > { %1241 = dma.done.wait (%p1645_p8), [#allocation7], 128   ;;  %p1646_p10 = pmov %p1645_p8 }
  0x74   : > { %p1647_p2 = pmov %p1645_p8 }
  0x75   : > { %1243 = vsyncadd (%p1646_p10), [#allocation7], 4294967168 }
  0x76   : > { %1245 = dma.done.wait (%p1647_p2), [#allocation10], 256   ;;  %p1648_p4 = pmov %p1647_p2 }
  0x77   : > { %v1274_v0 = vmov 0.0   ;;  %vm1275_vm0 = vmmov 0   ;;  %vm338_vm1 = vcmask 64512   ;;  %v331_v1 = vld [vmem:[%s280_s17] sm:$0xff]  ;;  %v335_v3 = vld [vmem:[#allocation9 + $0x8] sm:$0xff]  ;;  %vm418_vm2 = vcmask 130048  }
  0x78   : > { %1247 = vsyncadd (%p1648_p4), [#allocation10], 4294967040  ;;  %944 = vmatprep.subr.mxu0 %v1274_v0  ;;  %946 = vmatprep.mubr.msk.f32.mxu0 %vm1275_vm0, %v1274_v0  ;;  %v333_v2 = vld [vmem:[#allocation8] sm:$0xff]  ;;  %v334_v4 = vld [vmem:[#allocation9] sm:$0xff]  ;;  %vm566_vm3 = vcmask 261120   ;;  %s916_s2 = sshll.u32 %s1333_s25, 7 }
  0x79   : > { %963 = vmatprep.subr.mxu1 %v1274_v0  ;;  %995 = vmatprep.mubr.msk.f32.mxu1 %vm1275_vm0, %v1274_v0  ;;  %v332_v7 = vld [vmem:[%s289_s20] sm:$0xff]  ;;  %579 = vst.msk [vmem:[#allocation2] sm:$0xff] %vm566_vm3, %v1274_v0  ;;  %580 = vst.msk [vmem:[#allocation2 + $0x8] sm:$0xff] %vm566_vm3, %v1274_v0  ;;  %v894_v17 = vld [vmem:[%s1624_s4] ss:$0 sm:$0xff]  ;;  %s330_s10 = scalar_lea.vmem [#allocation11], %s1474_s3  ;;  %s764_s15 = scalar_lea.hbm %s1626_s6, %s916_s2 }
  0x7a   : > { %945 = vmatpush3.msra.mxu0 %v331_v1  ;;  %581 = vst.msk [vmem:[#allocation2 + $0x10] sm:$0xff] %vm566_vm3, %v1274_v0  ;;  %582 = vst.msk [vmem:[#allocation2 + $0x18] sm:$0xff] %vm566_vm3, %v1274_v0  ;;  %v914_v43 = vld [vmem:[%s1625_s5] ss:$0 sm:$0xff]  ;;  %s766_s18 = sshll.u32 %s330_s10, 4  ;;  %s753_s26 = scalar_lea.sflag [#allocation5], %s1471_s11  ;;  %s767_s18 = int_to_ptr.vmem [resolvable:$true] %s766_s18 }
  0x7b   : > { %947 = vmatmul.mubr.msk.f32.vlgmr.msra.gmra.mxu0 %vm338_vm1, %v333_v2  ;;  %949 = vmatprep.subr.mxu0 %v1274_v0  ;;  %583 = vst.msk [vmem:[#allocation2 + $0x20] sm:$0xff] %vm566_vm3, %v1274_v0  ;;  %584 = vst.msk [vmem:[#allocation2 + $0x28] sm:$0xff] %vm566_vm3, %v1274_v0  ;;  %s1190_s14 = scalar_lea.vmem %s767_s18, 128  ;;  %p1649_p11 = scmp.ne.s32.totalorder %s1640_s30, 0 }
  0x7c   : > { %950 = vmatpush3.msra.mxu0 %v335_v3  ;;  %953 = vmatprep.mubr.msk.f32.mxu0 %vm1275_vm0, %v1274_v0  ;;  %585 = vst.msk [vmem:[#allocation2 + $0x30] sm:$0xff] %vm566_vm3, %v1274_v0  ;;  %586 = vst.msk [vmem:[#allocation2 + $0x38] sm:$0xff] %vm566_vm3, %v1274_v0  ;;  %p1191_p6 = scmp.ne.s32.totalorder %s767_s18, %s1190_s14  ;;  %s1276_s17 = smov [#allocation11]  }
  0x7d   : > { %951 = vmatprep.subr.mxu0 %v1274_v0  ;;  %587 = vst.msk [vmem:[#allocation2 + $0x40] sm:$0xff] %vm566_vm3, %v1274_v0  ;;  %588 = vst.msk [vmem:[#allocation2 + $0x48] sm:$0xff] %vm566_vm3, %v1274_v0  ;;  %s1194_s29 = sshll.u32 %s1276_s17, 4  ;;  %s1195_s29 = int_to_ptr.vmem [resolvable:$false] %s1194_s29 }
  0x7e   : > { %952 = vmatpush3.msra.mxu0 %v334_v4  ;;  %589 = vst.msk [vmem:[#allocation2 + $0x50] sm:$0xff] %vm566_vm3, %v1274_v0  ;;  %590 = vst.msk [vmem:[#allocation2 + $0x58] sm:$0xff] %vm566_vm3, %v1274_v0  ;;  %p1192_p0 = pnand %p1191_p6, %p1649_p11  ;;  %s1196_s25 = scalar_lea.vmem %s1195_s29, 256 }
  0x7f   : > { %956 = vmatprep.subr.mxu0 %v1274_v0  ;;  %591 = vst.msk [vmem:[#allocation2 + $0x60] sm:$0xff] %vm566_vm3, %v1274_v0  ;;  %592 = vst.msk [vmem:[#allocation2 + $0x68] sm:$0xff] %vm566_vm3, %v1274_v0  ;;  %p1197_p7 = scmp.lt.s32.totalorder %s767_s18, %s1195_s29  ;;  %p1198_p12 = scmp.lt.s32.totalorder %s1196_s25, %s1190_s14 }
  0x80   : > { %593 = vst.msk [vmem:[#allocation2 + $0x70] sm:$0xff] %vm566_vm3, %v1274_v0  ;;  %594 = vst.msk [vmem:[#allocation2 + $0x78] sm:$0xff] %vm566_vm3, %v1274_v0  ;;  %v597_v29 = vld [vmem:[#allocation2 + $0x8] sm:$0xff]  ;;  %p1193_p3 = pneg %p1192_p0 }
  0x81   : > { %v599_v26 = vld [vmem:[#allocation2 + $0x18] sm:$0xff]  ;;  %v598_v27 = vld [vmem:[#allocation2 + $0x10] sm:$0xff]  ;;  %p1199_p9 = por %p1198_p12, %p1197_p7 }
  0x82   : > { %v601_v24 = vld [vmem:[#allocation2 + $0x28] sm:$0xff]  ;;  %v600_v25 = vld [vmem:[#allocation2 + $0x20] sm:$0xff] }
  0x83   : > { %v603_v16 = vld [vmem:[#allocation2 + $0x38] sm:$0xff]  ;;  %v602_v23 = vld [vmem:[#allocation2 + $0x30] sm:$0xff]  ;;  %p1200_p13 = pnand %p1199_p9, %p1193_p3 }
  0x84   : > { %v605_v14 = vld [vmem:[#allocation2 + $0x48] sm:$0xff]  ;;  %v604_v15 = vld [vmem:[#allocation2 + $0x40] sm:$0xff] }
  0x85   : > { %v607_v12 = vld [vmem:[#allocation2 + $0x58] sm:$0xff]  ;;  %v606_v13 = vld [vmem:[#allocation2 + $0x50] sm:$0xff] }
  0x86   : > { %v609_v10 = vld [vmem:[#allocation2 + $0x68] sm:$0xff]  ;;  %v608_v11 = vld [vmem:[#allocation2 + $0x60] sm:$0xff] }
  0x87   : > { %v611_v8 = vld [vmem:[#allocation2 + $0x78] sm:$0xff]  ;;  %v610_v9 = vld [vmem:[#allocation2 + $0x70] sm:$0xff] }
  0x88   : > { %964 = vmatpush3.xpose.msk.msra.mxu1 %vm566_vm3, %v611_v8 }
  0x89   : > { %965 = vmatprep.subr.mxu1 %v1274_v0 }
  0x8c   : > { %966 = vmatpush3.xpose.msk.msra.mxu1 %vm566_vm3, %v610_v9 }
  0x8d   : > { %967 = vmatprep.subr.mxu1 %v1274_v0 }
  0x90   : > { %968 = vmatpush3.xpose.msk.msra.mxu1 %vm566_vm3, %v609_v10 }
  0x91   : > { %969 = vmatprep.subr.mxu1 %v1274_v0 }
  0x94   : > { %970 = vmatpush3.xpose.msk.msra.mxu1 %vm566_vm3, %v608_v11 }
  0x95   : > { %971 = vmatprep.subr.mxu1 %v1274_v0 }
  0x98   : > { %972 = vmatpush3.xpose.msk.msra.mxu1 %vm566_vm3, %v607_v12 }
  0x99   : > { %973 = vmatprep.subr.mxu1 %v1274_v0 }
  0x9c   : > { %974 = vmatpush3.xpose.msk.msra.mxu1 %vm566_vm3, %v606_v13 }
  0x9d   : > { %975 = vmatprep.subr.mxu1 %v1274_v0 }
  0xa0   : > { %976 = vmatpush3.xpose.msk.msra.mxu1 %vm566_vm3, %v605_v14 }
  0xa1   : > { %977 = vmatprep.subr.mxu1 %v1274_v0 }
  0xa4   : > { %978 = vmatpush3.xpose.msk.msra.mxu1 %vm566_vm3, %v604_v15 }
  0xa5   : > { %979 = vmatprep.subr.mxu1 %v1274_v0 }
  0xa8   : > { %980 = vmatpush3.xpose.msk.msra.mxu1 %vm566_vm3, %v603_v16 }
  0xa9   : > { %981 = vmatprep.subr.mxu1 %v1274_v0 }
  0xac   : > { %982 = vmatpush3.xpose.msk.msra.mxu1 %vm566_vm3, %v602_v23 }
  0xad   : > { %983 = vmatprep.subr.mxu1 %v1274_v0 }
  0xb0   : > { %984 = vmatpush3.xpose.msk.msra.mxu1 %vm566_vm3, %v601_v24 }
  0xb1   : > { %985 = vmatprep.subr.mxu1 %v1274_v0 }
  0xb4   : > { %986 = vmatpush3.xpose.msk.msra.mxu1 %vm566_vm3, %v600_v25 }
  0xb5   : > { %987 = vmatprep.subr.mxu1 %v1274_v0 }
  0xb8   : > { %988 = vmatpush3.xpose.msk.msra.mxu1 %vm566_vm3, %v599_v26 }
  0xb9   : > { %989 = vmatprep.subr.mxu1 %v1274_v0 }
  0xbc   : > { %990 = vmatpush3.xpose.msk.msra.mxu1 %vm566_vm3, %v598_v27 }
  0xbd   : > { %991 = vmatprep.subr.mxu1 %v1274_v0 }
  0xc0   : > { %992 = vmatpush3.xpose.msk.msra.mxu1 %vm566_vm3, %v597_v29 }
  0xc1   : > { %993 = vmatprep.subr.mxu1 %v1274_v0 }
 0x13b   : > { %v408_v5 = vpop.f32.mrf.mxu0 }
 0x13c   : > { %954 = vmatmul.mubr.msk.f32.vlgmr.msra.gmra.mxu0 %vm418_vm2, %v408_v5 }
 0x13d   : > { %v948_v6 = vpop.f32.mrf.mxu0  ;;  %957 = vmatpush3.msra.mxu0 %v335_v3  ;;  %960 = vmatprep.mubr.msk.f32.mxu0 %vm1275_vm0, %v1274_v0 }
 0x13e   : > { %958 = vmatprep.subr.mxu0 %v1274_v0 }
 0x13f   : > { %959 = vmatpush3.msra.mxu0 %v334_v4 }
 0x140   : > { %961 = vmatmul.mubr.msk.f32.vlgmr.msra.gmra.mxu0 %vm418_vm2, %v332_v7 }
 0x1fc   : > { %v488_v18 = vpop.f32.mrf.mxu0 }
 0x1fd   : > { %v489_v19 = vadd.f32 %v894_v17, %v488_v18 }
 0x1fe   : > { %v955_v20 = vpop.f32.mrf.mxu0 }
 0x1ff   : > { %v565_v21 = vmul.f32 %v489_v19, %v489_v19 }
 0x200   : > { %v561_v28 = vpop.f32.mrf.mxu0 }
 0x201   : > { %v567_v22 = vsel %vm566_vm3, %v565_v21, 0.0  ;;  %v562_v31 = vadd.f32 %v894_v17, %v561_v28 }
 0x202   : > { %568 = vadd.xlane.f32.xlu0 %v567_v22  ;;  %v962_v30 = vpop.f32.mrf.mxu0 }
 0x203   : > { %v570_v32 = vmul.f32 %v562_v31, %v562_v31 }
 0x205   : > { %v571_v33 = vsel %vm566_vm3, %v570_v32, 0.0 }
 0x206   : > { %572 = vadd.xlane.f32.xlu0 %v571_v33 }
 0x28b   : > { %v569_v34 = vpop.xlane.xlu0 %568 }
 0x28c   : > { %v574_v35 = vmax.f32 %v569_v34, 1e-16 }
 0x28e   : > { %1074 = vrsqrt.f32 %v574_v35 }
 0x28f   : > { %v573_v39 = vpop.xlane.xlu0 %572 }
 0x290   : > { %v577_v40 = vmax.f32 %v573_v39, 1e-16 }
 0x292   : > { %1076 = vrsqrt.f32 %v577_v40 }
 0x29b   : > { %v1075_v36 = vpop.eup %1074 }
 0x29c   : > { %v576_v37 = vmul.f32 %v1075_v36, %v489_v19 }
 0x29e   : > { %595 = vst.msk [vmem:[#allocation2] sm:$0xff] %vm566_vm3, %v576_v37 }
 0x29f   : > { %v1077_v41 = vpop.eup %1076 }
 0x2a5   : > { %v596_v38 = vld [vmem:[#allocation2] sm:$0xff] }
 0x2a6   : > { %994 = vmatpush3.xpose.msk.msra.mxu1 %vm566_vm3, %v596_v38 }
 0x2a9   : > { %996 = vmatmul.mubr.msk.f32.vlgmr.msra.gmra.mxu1 %vm566_vm3, %v562_v31 }
 0x369   : > { %v729_v42 = vpop.f32.mrf.mxu1 }
 0x36a   : > { %v733_v44 = vmul.f32 %v1077_v41, %v729_v42 }
 0x36b   : > { %v997_v45 = vpop.f32.mrf.mxu1 }
 0x36c   : > { %v740_v46 = vadd.f32 %v914_v43, %v733_v44 }
 0x36e   : > { %741 = vmax.xlane.f32.xlu1 %v740_v46 }
 0x3f7   : > { %v742_v47 = vpop.xlane.xlu1 %741 }
 0x3f8   : > { %v743_v48 = vsub.f32 %v740_v46, %v742_v47 }
 0x3fa   : > { %v744_v49 = vmul.f32 1.442695, %v743_v48 }
 0x3fc   : > { %1078 = vpow2.f32 %v744_v49 }
 0x409   : > { %v1079_v50 = vpop.eup %1078 }
 0x40a   : > { %746 = vadd.xlane.f32.xlu1 %v1079_v50 }
 0x493   : > { %v747_v51 = vpop.xlane.xlu1 %746 }
 0x494   : > { %1080 = vlog2.f32 %v747_v51 }
 0x4a1   : > { %v1081_v52 = vpop.eup %1080 }
 0x4a2   : > { %v749_v53 = vmul.f32 0.6931472, %v1081_v52 }
 0x4a4   : > { %v750_v54 = vsub.f32 %v743_v48, %v749_v53 }
 0x4a6   : > { %751 = vst [vmem:[%s330_s10] sm:$0xff] %v750_v54 }
 0x4a7   : > { %1203 = shalt.err (!%p1200_p13)
}
 0x4a8   : > { %s1204_s3 = scalar_lea.hbm %s764_s15, 128  ;;  %s1208_s20 = scalar_lea.hbm %s1626_s6, 768 }
 0x4a9   : > { %p1205_p1 = scmp.ne.s32.totalorder %s764_s15, %s1204_s3  ;;  %p1209_p10 = scmp.lt.s32.totalorder %s764_s15, %s1626_s6 }
 0x4aa   : > { %p1210_p2 = scmp.lt.s32.totalorder %s1208_s20, %s1204_s3 }
 0x4ab   : > { %p1206_p5 = pnand %p1205_p1, %p1649_p11 }
 0x4ac   : > { %p1211_p4 = por %p1210_p2, %p1209_p10 }
 0x4ad   : > { %p1207_p8 = pneg %p1206_p5 }
 0x4af   : > { %p1212_p6 = pnand %p1211_p4, %p1207_p8 }
 0x4b1   : > { %1215 = shalt.err (!%p1212_p6)
}
 0x4b2   : > { %1010 = dma.vmem_to_hbm [thread:$0]  (%p1649_p11), %s767_s18, 128, %s764_s15, %s753_s26  }
 0x4b3 PF: > { %p1035_p0 = scmp.ge.s32.totalorder %s1266_s24, 2  ;;  %s778_s12 = sand.u32 1, %s1254_s21  }
 0x4b4   : > { %p1650_p3 = scmp.ne.s32.totalorder %s1634_s28, 0  ;;  %s779_s8 = scalar_lea.sflag [#allocation5], %s778_s12 }
 0x4b6   : > { %p1027_p7 = pnand %p1035_p0, %p1650_p3 }
 0x4b8   : > { %p1028_p12 = pneg %p1027_p7 }
 0x4ba   : > { %1249 = dma.done.wait (%p1028_p12), %s779_s8, 128  }
 0x4bb   : > { %1251 = vsyncadd (%p1028_p12), %s779_s8, 4294967168  ;;  %s1651_s2 = sld [smem:[#allocation17_spill]]  ;;  %p23_p9 = scmp.ge.s32.totalorder %s1383_s19, 8  }
 0x4bc   : > { %s1652_s21 = smov %s1258_s22  ;;  %s1653_s22 = smov %s1262_s23 }
 0x4bd   : > { %s1655_s24 = smov %s1383_s19  ;;  %25 = sbr.rel (!%p23_p9) target bundleno = 11 (0xb), region = 110 }
 0x4c1   : > { %s1654_s23 = smov %s1651_s2 }
 0x4c2   :  { %784 = vsyncpa [#allocation4], 1 }
 0x4c3   :  { %786 = vsyncpa [#allocation4 + $0x1], 1 }
 0x4c4   :  { %787 = vsyncpa [#allocation7], 1 }
 0x4c5   :  { %789 = vsyncpa [#allocation7 + $0x1], 1 }
 0x4c6   :  { %790 = vsyncpa [#allocation10], 1 }
 0x4c7   :  { %791 = vsyncpa [#allocation5], 1 }
 0x4c8   :  { %793 = vsyncpa [#allocation5 + $0x1], 1 }

</bundles_post_ra>
